<compile_context>
chip_gen: v7x
topology: tpu7x:2x2x1
jax: 0.10.0
libtpu: 0.0.40
codegen_flags: <defaults>
</compile_context>

<pallas_src>
import functools

import jax
import jax.numpy as jnp
from jax.experimental import pallas as pl
from jax.experimental.pallas import tpu as pltpu


def _round_up(a, b):
    return (a + b - 1) // b * b


def dr_fused_kernel(x_ref, w_ref, g_ref, b_ref, o_ref,
                    sum_ref, sq_ref, scale_ref, shift_ref,
                    *, inv_m, eps):
    p = pl.program_id(0)          # 0: stats pass, 1: normalize pass
    n = pl.program_id(1)          # batch index
    i = pl.program_id(2)          # spatial tile index
    first = (n == 0) & (i == 0)
    last = (n == pl.num_programs(1) - 1) & (i == pl.num_programs(2) - 1)

    @pl.when((p == 0) & first)
    def _():
        sum_ref[...] = jnp.zeros_like(sum_ref)
        sq_ref[...] = jnp.zeros_like(sq_ref)

    # 1x1 conv == [Cout, Cin] @ [Cin, tile_m]; lanes carry the spatial axis.
    y = jnp.dot(w_ref[...], x_ref[...], preferred_element_type=jnp.float32)

    @pl.when(p == 0)
    def _():
        sum_ref[...] += jnp.sum(y, axis=1, keepdims=True)
        sq_ref[...] += jnp.sum(y * y, axis=1, keepdims=True)

    @pl.when((p == 0) & last)
    def _():
        # Fold batch statistics + BN affine into per-channel scale/shift.
        mean = sum_ref[...] * inv_m
        var = sq_ref[...] * inv_m - mean * mean     # biased variance
        inv_std = jax.lax.rsqrt(var + eps)
        s = g_ref[...] * inv_std
        scale_ref[...] = s
        shift_ref[...] = b_ref[...] - mean * s

    @pl.when(p == 1)
    def _():
        o_ref[...] = jnp.maximum(y * scale_ref[...] + shift_ref[...], 0.0)


def dr_forward(x_nchw, conv_weight, gamma, beta, eps=1e-5, tile_m=2048):
    N, Cin, H, W = x_nchw.shape
    Cout = conv_weight.shape[0]
    HW = H * W

    # Choose a lane tile: split HW into roughly tile_m-sized, 128-aligned tiles.
    tgt = max(128, _round_up(int(tile_m), 128))
    n_tiles = max(1, -(-HW // tgt))               # cdiv
    tile = _round_up(-(-HW // n_tiles), 128)      # 128-aligned per-step tile
    hw_pad = n_tiles * tile

    x3 = x_nchw.reshape(N, Cin, HW).astype(jnp.float32)
    if hw_pad != HW:
        # Zero padding: padded columns produce y == 0, so they add nothing to
        # sum / sumsq; the stats divisor below uses the real element count.
        x3 = jnp.pad(x3, ((0, 0), (0, 0), (0, hw_pad - HW)))

    w = conv_weight[:, :, 0, 0].astype(jnp.float32)          # [Cout, Cin]
    g = gamma.astype(jnp.float32).reshape(Cout, 1)
    b = beta.astype(jnp.float32).reshape(Cout, 1)

    inv_m = 1.0 / float(N * HW)

    kernel = functools.partial(dr_fused_kernel, inv_m=inv_m, eps=float(eps))

    out = pl.pallas_call(
        kernel,
        out_shape=jax.ShapeDtypeStruct((N, Cout, hw_pad), jnp.float32),
        grid_spec=pltpu.PrefetchScalarGridSpec(
            num_scalar_prefetch=0,
            grid=(2, N, n_tiles),                 # (pass, batch, spatial tile)
            in_specs=[
                pl.BlockSpec((None, Cin, tile), lambda p, n, i: (n, 0, i)),
                pl.BlockSpec((Cout, Cin), lambda p, n, i: (0, 0)),
                pl.BlockSpec((Cout, 1), lambda p, n, i: (0, 0)),
                pl.BlockSpec((Cout, 1), lambda p, n, i: (0, 0)),
            ],
            # During the stats pass (p==0) the output window is pinned to
            # block (0, 0, 0) and never written, so no HBM writeback happens;
            # pass 1 visits every block exactly once and writes valid data.
            out_specs=pl.BlockSpec((None, Cout, tile),
                                   lambda p, n, i: (p * n, 0, p * i)),
            scratch_shapes=[
                pltpu.VMEM((Cout, 1), jnp.float32),   # sum
                pltpu.VMEM((Cout, 1), jnp.float32),   # sumsq
                pltpu.VMEM((Cout, 1), jnp.float32),   # scale
                pltpu.VMEM((Cout, 1), jnp.float32),   # shift
            ],
        ),
        compiler_params=pltpu.CompilerParams(
            dimension_semantics=("arbitrary", "arbitrary", "arbitrary")),
    )(x3, w, g, b)

    out = out[:, :, :HW].reshape(N, Cout, H, W)
    return out


def dr_reference(x_nchw, conv_weight, gamma, beta, eps=1e-5):
    """Pure-JAX reference of the PyTorch forward (training-mode BN)."""
    w = conv_weight[:, :, 0, 0]                       # [Cout, Cin]
    y = jnp.einsum("nchw,oc->nohw", x_nchw, w)        # 1x1 conv, no bias
    mean = jnp.mean(y, axis=(0, 2, 3), keepdims=True)
    var = jnp.mean((y - mean) ** 2, axis=(0, 2, 3), keepdims=True)  # biased
    y = (y - mean) / jnp.sqrt(var + eps)
    y = y * gamma[None, :, None, None] + beta[None, :, None, None]
    return jnp.maximum(y, 0.0)


if __name__ == "__main__":
    # Small shapes consistent with DR(in_d=4, out_d=8) on a 2x4x16x16 input.
    in_d, out_d = 4, 8
    N, H, W = 2, 16, 16

    key = jax.random.PRNGKey(0)
    kx, kw = jax.random.split(key)
    x = jax.random.normal(kx, (N, in_d, H, W), dtype=jnp.float32)
    # Deterministic conv weight, torch shape (out_d, in_d, 1, 1); bias=False.
    conv_weight = 0.1 * jax.random.normal(kw, (out_d, in_d, 1, 1), dtype=jnp.float32)
    # BatchNorm2d default-initialized affine params.
    gamma = jnp.ones((out_d,), dtype=jnp.float32)
    beta = jnp.zeros((out_d,), dtype=jnp.float32)

    out = jax.block_until_ready(dr_forward(x, conv_weight, gamma, beta))
    ref = dr_reference(x, conv_weight, gamma, beta)
    assert out.shape == (N, out_d, H, W)
    assert jnp.allclose(out, ref, atol=1e-4, rtol=1e-4), "mismatch vs reference"

    # Non-128-aligned spatial size exercises the zero-padded tail path.
    x2 = jax.random.normal(jax.random.PRNGKey(1), (3, in_d, 10, 10), jnp.float32)
    out2 = jax.block_until_ready(dr_forward(x2, conv_weight, gamma, beta))
    ref2 = dr_reference(x2, conv_weight, gamma, beta)
    assert out2.shape == (3, out_d, 10, 10)
    assert jnp.allclose(out2, ref2, atol=1e-4, rtol=1e-4), "mismatch (padded tail)"

    print("KERNEL_OK")
</pallas_src>

<mosaic_0001>
module attributes {stable_mosaic.version = 11 : i64} {
  func.func @dr_fused_kernel(%arg0: i32, %arg1: i32, %arg2: i32, %arg3: memref<1x4x256xf32, #tpu.memory_space<vmem>>, %arg4: memref<8x4xf32, #tpu.memory_space<vmem>>, %arg5: memref<8x1xf32, #tpu.memory_space<vmem>>, %arg6: memref<8x1xf32, #tpu.memory_space<vmem>>, %arg7: memref<1x8x256xf32, #tpu.memory_space<vmem>>, %arg8: memref<8x1xf32, #tpu.memory_space<vmem>>, %arg9: memref<8x1xf32, #tpu.memory_space<vmem>>, %arg10: memref<8x1xf32, #tpu.memory_space<vmem>>, %arg11: memref<8x1xf32, #tpu.memory_space<vmem>>) attributes {dimension_semantics = [#tpu.dimension_semantics<arbitrary>, #tpu.dimension_semantics<arbitrary>, #tpu.dimension_semantics<arbitrary>], iteration_bounds = array<i64: 2, 2, 1>, scalar_prefetch = 0 : i64, scratch_operands = 4 : i64, tpu.core_type = #tpu.core_type<tc>, window_params = [{transform_indices = @transform_0, window_bounds = array<i64: 1, 4, 256>}, {pipeline_mode = #tpu.pipeline_mode<synchronous>, transform_indices = @transform_1, window_bounds = array<i64: 8, 4>}, {pipeline_mode = #tpu.pipeline_mode<synchronous>, transform_indices = @transform_2, window_bounds = array<i64: 8, 1>}, {pipeline_mode = #tpu.pipeline_mode<synchronous>, transform_indices = @transform_3, window_bounds = array<i64: 8, 1>}, {transform_indices = @transform_4, window_bounds = array<i64: 1, 8, 256>}]} {
    %c0_i32 = arith.constant 0 : i32
    %0 = arith.cmpi eq, %arg1, %c0_i32 : i32
    %c0_i32_0 = arith.constant 0 : i32
    %1 = arith.cmpi eq, %arg2, %c0_i32_0 : i32
    %2 = arith.andi %0, %1 : i1
    %c1_i32 = arith.constant 1 : i32
    %3 = arith.cmpi eq, %arg1, %c1_i32 : i32
    %c0_i32_1 = arith.constant 0 : i32
    %4 = arith.cmpi eq, %arg2, %c0_i32_1 : i32
    %5 = arith.andi %3, %4 : i1
    %c0_i32_2 = arith.constant 0 : i32
    %6 = arith.cmpi eq, %arg0, %c0_i32_2 : i32
    %7 = arith.andi %6, %2 : i1
    %8 = arith.extui %7 : i1 to i32
    %c0_i32_3 = arith.constant 0 : i32
    %9 = arith.cmpi ne, %8, %c0_i32_3 : i32
    scf.if %9 {
      %cst_14 = arith.constant 0.000000e+00 : f32
      %24 = vector.broadcast %cst_14 : f32 to vector<8x1xf32>
      %c0_15 = arith.constant 0 : index
      %c0_16 = arith.constant 0 : index
      %25 = vector.load %arg8[%c0_15, %c0_16] : memref<8x1xf32, #tpu.memory_space<vmem>>, vector<8x1xf32>
      tpu.vector_store %arg8[%c0_15, %c0_16], %24 {strides = array<i32>} : memref<8x1xf32, #tpu.memory_space<vmem>>, vector<8x1xf32>,
      %cst_17 = arith.constant 0.000000e+00 : f32
      %26 = vector.broadcast %cst_17 : f32 to vector<8x1xf32>
      %c0_18 = arith.constant 0 : index
      %c0_19 = arith.constant 0 : index
      %27 = vector.load %arg9[%c0_18, %c0_19] : memref<8x1xf32, #tpu.memory_space<vmem>>, vector<8x1xf32>
      tpu.vector_store %arg9[%c0_18, %c0_19], %26 {strides = array<i32>} : memref<8x1xf32, #tpu.memory_space<vmem>>, vector<8x1xf32>,
    } else {
    }
    %c0 = arith.constant 0 : index
    %c0_4 = arith.constant 0 : index
    %10 = vector.load %arg4[%c0, %c0_4] : memref<8x4xf32, #tpu.memory_space<vmem>>, vector<8x4xf32>
    %c0_5 = arith.constant 0 : index
    %c0_6 = arith.constant 0 : index
    %c0_7 = arith.constant 0 : index
    %11 = vector.load %arg3[%c0_5, %c0_6, %c0_7] : memref<1x4x256xf32, #tpu.memory_space<vmem>>, vector<1x4x256xf32>
    %12 = vector.shape_cast %11 : vector<1x4x256xf32> to vector<4x256xf32>
    %cst = arith.constant dense<0.000000e+00> : vector<8x256xf32>
    %13 = tpu.matmul %10, %12, %cst {dimension_numbers = #tpu.dot_dimension_numbers<[1], [0], [0], [1], [0, 0, 1, 1], [], []>} : vector<8x4xf32>, vector<4x256xf32>, vector<8x256xf32> -> vector<8x256xf32>
    %c0_i32_8 = arith.constant 0 : i32
    %14 = arith.cmpi eq, %arg0, %c0_i32_8 : i32
    %15 = arith.extui %14 : i1 to i32
    %c0_i32_9 = arith.constant 0 : i32
    %16 = arith.cmpi ne, %15, %c0_i32_9 : i32
    scf.if %16 {
      %c0_14 = arith.constant 0 : index
      %c0_15 = arith.constant 0 : index
      %24 = vector.load %arg8[%c0_14, %c0_15] : memref<8x1xf32, #tpu.memory_space<vmem>>, vector<8x1xf32>
      %cst_16 = arith.constant dense<0.000000e+00> : vector<8xf32>
      %25 = vector.multi_reduction <add>, %13, %cst_16 [1] : vector<8x256xf32> to vector<8xf32>
      %26 = vector.shape_cast %25 : vector<8xf32> to vector<8x1xf32>
      %27 = arith.addf %24, %26 : vector<8x1xf32>
      %c0_17 = arith.constant 0 : index
      %c0_18 = arith.constant 0 : index
      %28 = vector.load %arg8[%c0_17, %c0_18] : memref<8x1xf32, #tpu.memory_space<vmem>>, vector<8x1xf32>
      tpu.vector_store %arg8[%c0_17, %c0_18], %27 {strides = array<i32>} : memref<8x1xf32, #tpu.memory_space<vmem>>, vector<8x1xf32>,
      %c0_19 = arith.constant 0 : index
      %c0_20 = arith.constant 0 : index
      %29 = vector.load %arg9[%c0_19, %c0_20] : memref<8x1xf32, #tpu.memory_space<vmem>>, vector<8x1xf32>
      %30 = arith.mulf %13, %13 : vector<8x256xf32>
      %cst_21 = arith.constant dense<0.000000e+00> : vector<8xf32>
      %31 = vector.multi_reduction <add>, %30, %cst_21 [1] : vector<8x256xf32> to vector<8xf32>
      %32 = vector.shape_cast %31 : vector<8xf32> to vector<8x1xf32>
      %33 = arith.addf %29, %32 : vector<8x1xf32>
      %c0_22 = arith.constant 0 : index
      %c0_23 = arith.constant 0 : index
      %34 = vector.load %arg9[%c0_22, %c0_23] : memref<8x1xf32, #tpu.memory_space<vmem>>, vector<8x1xf32>
      tpu.vector_store %arg9[%c0_22, %c0_23], %33 {strides = array<i32>} : memref<8x1xf32, #tpu.memory_space<vmem>>, vector<8x1xf32>,
    } else {
    }
    %c0_i32_10 = arith.constant 0 : i32
    %17 = arith.cmpi eq, %arg0, %c0_i32_10 : i32
    %18 = arith.andi %17, %5 : i1
    %19 = arith.extui %18 : i1 to i32
    %c0_i32_11 = arith.constant 0 : i32
    %20 = arith.cmpi ne, %19, %c0_i32_11 : i32
    scf.if %20 {
      %c0_14 = arith.constant 0 : index
      %c0_15 = arith.constant 0 : index
      %24 = vector.load %arg8[%c0_14, %c0_15] : memref<8x1xf32, #tpu.memory_space<vmem>>, vector<8x1xf32>
      %cst_16 = arith.constant 0.001953125 : f32
      %25 = vector.broadcast %cst_16 : f32 to vector<8x1xf32>
      %26 = arith.mulf %24, %25 : vector<8x1xf32>
      %c0_17 = arith.constant 0 : index
      %c0_18 = arith.constant 0 : index
      %27 = vector.load %arg9[%c0_17, %c0_18] : memref<8x1xf32, #tpu.memory_space<vmem>>, vector<8x1xf32>
      %cst_19 = arith.constant 0.001953125 : f32
      %28 = vector.broadcast %cst_19 : f32 to vector<8x1xf32>
      %29 = arith.mulf %27, %28 : vector<8x1xf32>
      %30 = arith.mulf %26, %26 : vector<8x1xf32>
      %31 = arith.subf %29, %30 : vector<8x1xf32>
      %cst_20 = arith.constant 9.99999974E-6 : f32
      %32 = vector.broadcast %cst_20 : f32 to vector<8x1xf32>
      %33 = arith.addf %31, %32 : vector<8x1xf32>
      %34 = math.rsqrt %33 : vector<8x1xf32>
      %c0_21 = arith.constant 0 : index
      %c0_22 = arith.constant 0 : index
      %35 = vector.load %arg5[%c0_21, %c0_22] : memref<8x1xf32, #tpu.memory_space<vmem>>, vector<8x1xf32>
      %36 = arith.mulf %35, %34 : vector<8x1xf32>
      %c0_23 = arith.constant 0 : index
      %c0_24 = arith.constant 0 : index
      %37 = vector.load %arg10[%c0_23, %c0_24] : memref<8x1xf32, #tpu.memory_space<vmem>>, vector<8x1xf32>
      tpu.vector_store %arg10[%c0_23, %c0_24], %36 {strides = array<i32>} : memref<8x1xf32, #tpu.memory_space<vmem>>, vector<8x1xf32>,
      %c0_25 = arith.constant 0 : index
      %c0_26 = arith.constant 0 : index
      %38 = vector.load %arg6[%c0_25, %c0_26] : memref<8x1xf32, #tpu.memory_space<vmem>>, vector<8x1xf32>
      %39 = arith.mulf %26, %36 : vector<8x1xf32>
      %40 = arith.subf %38, %39 : vector<8x1xf32>
      %c0_27 = arith.constant 0 : index
      %c0_28 = arith.constant 0 : index
      %41 = vector.load %arg11[%c0_27, %c0_28] : memref<8x1xf32, #tpu.memory_space<vmem>>, vector<8x1xf32>
      tpu.vector_store %arg11[%c0_27, %c0_28], %40 {strides = array<i32>} : memref<8x1xf32, #tpu.memory_space<vmem>>, vector<8x1xf32>,
    } else {
    }
    %c1_i32_12 = arith.constant 1 : i32
    %21 = arith.cmpi eq, %arg0, %c1_i32_12 : i32
    %22 = arith.extui %21 : i1 to i32
    %c0_i32_13 = arith.constant 0 : i32
    %23 = arith.cmpi ne, %22, %c0_i32_13 : i32
    scf.if %23 {
      %c0_14 = arith.constant 0 : index
      %c0_15 = arith.constant 0 : index
      %24 = vector.load %arg10[%c0_14, %c0_15] : memref<8x1xf32, #tpu.memory_space<vmem>>, vector<8x1xf32>
      %25 = vector.broadcast %24 : vector<8x1xf32> to vector<8x256xf32>
      %26 = arith.mulf %13, %25 : vector<8x256xf32>
      %c0_16 = arith.constant 0 : index
      %c0_17 = arith.constant 0 : index
      %27 = vector.load %arg11[%c0_16, %c0_17] : memref<8x1xf32, #tpu.memory_space<vmem>>, vector<8x1xf32>
      %28 = vector.broadcast %27 : vector<8x1xf32> to vector<8x256xf32>
      %29 = arith.addf %26, %28 : vector<8x256xf32>
      %cst_18 = arith.constant 0.000000e+00 : f32
      %30 = vector.broadcast %cst_18 : f32 to vector<8x256xf32>
      %31 = arith.maximumf %29, %30 : vector<8x256xf32>
      %c0_19 = arith.constant 0 : index
      %c0_20 = arith.constant 0 : index
      %c0_21 = arith.constant 0 : index
      %32 = vector.load %arg7[%c0_19, %c0_20, %c0_21] : memref<1x8x256xf32, #tpu.memory_space<vmem>>, vector<1x8x256xf32>
      %33 = vector.shape_cast %32 : vector<1x8x256xf32> to vector<8x256xf32>
      %34 = vector.shape_cast %31 : vector<8x256xf32> to vector<1x8x256xf32>
      tpu.vector_store %arg7[%c0_19, %c0_20, %c0_21], %34 {strides = array<i32>} : memref<1x8x256xf32, #tpu.memory_space<vmem>>, vector<1x8x256xf32>,
    } else {
    }
    return
  }
  func.func @transform_0(%arg0: i32, %arg1: i32, %arg2: i32) -> (i32, i32, i32) {
    %c0_i32 = arith.constant 0 : i32
    %c0_i32_0 = arith.constant 0 : i32
    return %arg1, %c0_i32, %arg2 : i32, i32, i32
  }
  func.func @transform_1(%arg0: i32, %arg1: i32, %arg2: i32) -> (i32, i32) {
    %c0_i32 = arith.constant 0 : i32
    %c0_i32_0 = arith.constant 0 : i32
    %c0_i32_1 = arith.constant 0 : i32
    return %c0_i32, %c0_i32_0 : i32, i32
  }
  func.func @transform_2(%arg0: i32, %arg1: i32, %arg2: i32) -> (i32, i32) {
    %c0_i32 = arith.constant 0 : i32
    %c0_i32_0 = arith.constant 0 : i32
    %c0_i32_1 = arith.constant 0 : i32
    return %c0_i32, %c0_i32_0 : i32, i32
  }
  func.func @transform_3(%arg0: i32, %arg1: i32, %arg2: i32) -> (i32, i32) {
    %c0_i32 = arith.constant 0 : i32
    %c0_i32_0 = arith.constant 0 : i32
    %c0_i32_1 = arith.constant 0 : i32
    return %c0_i32, %c0_i32_0 : i32, i32
  }
  func.func @transform_4(%arg0: i32, %arg1: i32, %arg2: i32) -> (i32, i32, i32) {
    %0 = arith.muli %arg0, %arg1 : i32
    %1 = arith.muli %arg0, %arg2 : i32
    %c0_i32 = arith.constant 0 : i32
    %c0_i32_0 = arith.constant 0 : i32
    return %0, %c0_i32, %1 : i32, i32, i32
  }
}

</mosaic_0001>

<bundles_post_ra>
// kernel: tpu_custom_call.1
= control target key start
LH: loop header
LB: loop body
LE: loop exit
PB: predicated region body
PF: predicated region fallthrough
CT: control target
= control target key end

     0   :  { %9 = vsyncpa [#allocation7], 0  ;;  %s886_s0 = inlined_call_operand.vmem [shape: f32[2,4,256], index: 0, kind: input, shape index: {}]   ;;  %s887_s1 = inlined_call_operand.vmem [shape: f32[8,4], index: 1, kind: input, shape index: {}]   ;;  %s888_s2 = inlined_call_operand.vmem [shape: f32[8,1], index: 2, kind: input, shape index: {}]   ;;  %s889_s3 = inlined_call_operand.vmem [shape: f32[8,1], index: 3, kind: input, shape index: {}]   ;;  %s890_s4 = inlined_call_operand.hbm [shape: f32[2,8,256], index: 4, kind: output, shape index: {}]  }
   0x1   :  { %11 = vsyncpa [#allocation7 + $0x1], 0  ;;  %s729_s15 = smov 0   ;;  %s731_s16 = smov 0  }
   0x2   :  { %s733_s17 = smov 0   ;;  %s735_s18 = smov 0  }
   0x3   :  { %s737_s19 = smov 0   ;;  %s739_s20 = smov 0  }
   0x4   :  { %s741_s21 = smov 0   ;;  %s743_s22 = smov 0  }
   0x5 LB: > { %s502_s23 = sadd.s32 4294967295, %s698_s22   ;;  %s503_s24 = sadd.s32 4294967294, %s698_s22   ;;  %s698_s22 = sphi %s743_s22, %s17_s22   ;;  %s694_s21 = sphi %s741_s21, %s899_s21   ;;  %s690_s20 = sphi %s739_s20, %s898_s20   ;;  %s686_s19 = sphi %s737_s19, %s897_s19   ;;  %s682_s18 = sphi %s735_s18, %s896_s18   ;;  %s678_s17 = sphi %s733_s17, %s895_s17   ;;  %s674_s16 = sphi %s731_s16, %s894_s16   ;;  %s670_s15 = sphi %s729_s15, %s893_s15  }
   0x6   : > { %s32_s25 = sadd.s32 1, %s690_s20  ;;  %s36_s26 = sadd.s32 1, %s694_s21 }
   0x7   : > { %p34_p0 = scmp.ge.s32.totalorder %s32_s25, 2  ;;  %s131_s27 = smul.u32 %s690_s20, %s694_s21 }
   0x8   : > { %p150_p1 = scmp.ne.s32.totalorder %s678_s17, %s674_s16  ;;  %p151_p2 = scmp.eq.s32.totalorder %s502_s23, 3 }
   0x9   : > { %s901_s25 = smov (%p34_p0, %s32_s25), 0  ;;  %s903_s26 = smov (!%p34_p0, %s36_s26), %s694_s21 }
   0xa   : > { %p156_p3 = scmp.ne.s32.totalorder %s674_s16, %s670_s15  ;;  %p38_p4 = scmp.ge.s32.totalorder %s903_s26, 2 }
   0xb   : > { %p157_p5 = scmp.eq.s32.totalorder %s503_s24, 3  ;;  %p782_p6 = por %p151_p2, %p150_p1 }
   0xc   : > { %p506_p7 = scmp.ge.s32.totalorder %s698_s22, 1  ;;  %s905_s26 = smov (%p38_p4, %s903_s26), 0 }
   0xd   : > { %p789_p8 = por %p157_p5, %p156_p3  ;;  %p197_p9 = scmp.lt.s32.totalorder %s698_s22, 5 }
   0xe   : > { %s133_s30 = smul.u32 %s905_s26, %s901_s25  ;;  %s140_s6 = sadd.s32 1, %s678_s17 }
   0xf   : > { %p198_p10 = pnand %p506_p7, %p197_p9 }
  0x10   : > { %s135_s5 = ssub.s32 %s131_s27, %s133_s30  ;;  %s224_s8 = sand.u32 (!%p198_p10), 1, %s674_s16  }
  0x11   : > { %p138_p11 = scmp.eq.s32.totalorder %s135_s5, 0  ;;  %201 = sbr.rel (%p198_p10) target bundleno = 597 (0x255), region = 36 }
  0x12   : > { %p228_p12 = scmp.lt.s32.totalorder (!%p198_p10), %s682_s18, 1  ;;  %s507_s9 = sshll.u32 (!%p198_p10), %s224_s8, 4 }
  0x13   : > { %s798_s7 = scalar_select %p138_p11, %s678_s17, %s140_s6  }
  0x14   : > { %p240_p13 = scmp.eq.s32.totalorder (!%p198_p10), %s682_s18, 0  ;;  %p244_p0 = scmp.eq.s32.totalorder (!%p198_p10), %s682_s18, 1 }
  0x15   : > { %p247_p1 = scmp.eq.s32.totalorder (!%p198_p10), %s686_s19, 0  ;;  %s813_s23 = scalar_lea.vmem (!%p198_p10), [#allocation6], %s507_s9 }
  0x17   : > { %p248_p2 = pnand (!%p198_p10), %p247_p1, %p240_p13 }
  0x18   : > { %s229_s10 = scalar_select %p228_p12, %s682_s18, 1 }
  0x19   : > { %251 = sbr.rel (%p248_p2) target bundleno = 32 (0x20), region = 40  ;;  %vm252_vm0 = vcmask (!%p248_p2), 7168   ;;  %v700_v0 = vmov (!%p248_p2), 0.0  }
  0x1a   : > { %s522_s11 = sshll.u32 %s229_s10, 3  ;;  %253 = vst.msk [vmem:[#allocation2] sm:$0xff] (!%p248_p2), %vm252_vm0, %v700_v0  ;;  %254 = vst.msk [vmem:[#allocation3] sm:$0xff] (!%p248_p2), %vm252_vm0, %v700_v0 }
  0x1b   : > { %s235_s14 = scalar_lea.vmem %s886_s0, %s522_s11 }
  0x20 PF: > { %v256_v1 = vld [vmem:[%s235_s14] sm:$0xff]  ;;  %vm263_vm1 = vcmask 1043456   ;;  %v701_v3 = vmov 0.0   ;;  %vm259_vm2 = vcmask 31744   ;;  %p515_p3 = scmp.ne.s32.totalorder %s686_s19, 0 }
  0x21   : > { %v258_v2 = vcombine.high %v256_v1, %v256_v1  ;;  %332 = vmatprep.mubr.f32.mxu0 %v701_v3  ;;  %v255_v4 = vld [vmem:[%s887_s1] sm:$0xff]  ;;  %vm347_vm3 = vcmask (!%p515_p3), 7168   ;;  %v349_v14 = vld [vmem:[#allocation3] sm:$0xff] (!%p515_p3) }
  0x22   : > { %v342_v11 = vld [vmem:[#allocation2] sm:$0xff] (!%p515_p3) }
  0x23   : > { %512 = vmatprep.subr.msk.mxu0 %vm263_vm1, %v258_v2 }
  0x24   : > { %513 = vmatpush1.msk.msra.mxu0 %vm263_vm1, %v256_v1 }
  0x25   : > { %514 = vmatmul.mubr.msk.f32.vlgmr.msra.gmra.mrb[0].mxu0 %vm259_vm2, %v255_v4 }
  0xf3   : > { %341 = sbr.rel (%p515_p3) target bundleno = 401 (0x191), region = 44 }
  0xf8   : > { %v334_v5 = vpop.f32.mrb[0].mxu0 }
  0xf9   : > { %v336_v6 = vpop.f32.mrb[1].mxu0  ;;  %v350_v8 = vmul.f32 (!%p515_p3), %v334_v5, %v334_v5 }
  0xfa   : > { %v343_v7 = vadd.f32 %v336_v6, %v334_v5  ;;  %v351_v9 = vmul.f32 %v336_v6, %v336_v6 }
  0xfc   : > { %344 = vadd.xlane.f32.xlu0 %v343_v7  ;;  %v352_v10 = vadd.f32 %v351_v9, %v350_v8 }
 0x100   : > { %353 = vadd.xlane.f32.xlu0 %v352_v10 }
 0x189   : > { %v345_v12 = vpop.xlane.xlu0 %344 }
 0x18a   : > { %v346_v13 = vadd.f32 %v345_v12, %v342_v11 }
 0x18c   : > { %348 = vst.msk [vmem:[#allocation2] sm:$0xff] %vm347_vm3, %v346_v13 }
 0x18d   : > { %v354_v15 = vpop.xlane.xlu0 %353 }
 0x18e   : > { %v355_v16 = vadd.f32 %v354_v15, %v349_v14 }
 0x190   : > { %356 = vst.msk [vmem:[#allocation3] sm:$0xff] %vm347_vm3, %v355_v16 }
 0x191 PF: > { %p357_p4 = pnand %p247_p1, %p244_p0 }
 0x192   : > { %v369_v24 = vld [vmem:[%s888_s2] sm:$0xff] (!%p357_p4)  ;;  %vm371_vm4 = vcmask (!%p357_p4), 7168  }
 0x193   : > { %360 = sbr.rel (%p357_p4) target bundleno = 432 (0x1b0), region = 48  ;;  %v361_v17 = vld [vmem:[#allocation2] sm:$0xff] (!%p357_p4) }
 0x194   : > { %v362_v19 = vmul.f32 (!%p357_p4), 0.001953125, %v361_v17  ;;  %v373_v27 = vld [vmem:[%s889_s3] sm:$0xff] (!%p357_p4) }
 0x196   : > { %v365_v21 = vmul.f32 (!%p357_p4), %v362_v19, %v362_v19 }
 0x197   : > { %v363_v18 = vld [vmem:[#allocation3] sm:$0xff] (!%p357_p4) }
 0x198   : > { %v364_v20 = vmul.f32 (!%p357_p4), 0.001953125, %v363_v18 }
 0x19a   : > { %v366_v22 = vsub.f32 %v364_v20, %v365_v21 }
 0x19c   : > { %v367_v23 = vadd.f32 1e-05, %v366_v22 }
 0x19e   : > { %601 = vrsqrt.f32 %v367_v23 }
 0x1a8   : > { %v602_v25 = vpop.eup %601 }
 0x1a9   : > { %v370_v26 = vmul.f32 %v602_v25, %v369_v24 }
 0x1ab   : > { %372 = vst.msk [vmem:[#allocation4] sm:$0xff] %vm371_vm4, %v370_v26  ;;  %v374_v28 = vmul.f32 %v370_v26, %v362_v19 }
 0x1ad   : > { %v375_v29 = vsub.f32 %v373_v27, %v374_v28 }
 0x1af   : > { %376 = vst.msk [vmem:[#allocation5] sm:$0xff] %vm371_vm4, %v375_v29 }
 0x1b0 PF: > { %p516_p5 = scmp.ne.s32.totalorder %s686_s19, 1 }
 0x1b1   : > { %v702_v31 = vmov (!%p516_p5), 0  }
 0x1b2   : > { %380 = sbr.rel (%p516_p5) target bundleno = 572 (0x23c), region = 52  ;;  %v381_v30 = vld [vmem:[#allocation4] sm:$0xff] (!%p516_p5)  ;;  %603 = vset.pattern.permute.xlu0 (!%p516_p5), %v702_v31 }
 0x1b3   : > { %384 = vperm.xlu0 (!%p516_p5), %603, %v381_v30  }
 0x1b6   : > { %v389_v32 = vld [vmem:[#allocation5] sm:$0xff] (!%p516_p5) }
 0x1b7   : > { %392 = vperm.xlu0 (!%p516_p5), %603, %v389_v32  }
 0x232   : > { %v385_v33 = vpop.permute.xlu0 %384 }
 0x233   : > { %v387_v34 = vmul.f32 %v385_v33, %v334_v5  ;;  %v388_v35 = vmul.f32 %v385_v33, %v336_v6 }
 0x236   : > { %v393_v36 = vpop.permute.xlu0 %392 }
 0x237   : > { %v395_v37 = vadd.f32 %v393_v36, %v387_v34  ;;  %v396_v38 = vadd.f32 %v393_v36, %v388_v35 }
 0x239   : > { %v397_v39 = vmax.f32 %v395_v37, 0.0  ;;  %v398_v40 = vmax.f32 %v396_v38, 0.0 }
 0x23b   : > { %399 = vst [vmem:[%s813_s23] sm:$0xff] %v397_v39  ;;  %400 = vst [vmem:[%s813_s23 + $0x8] sm:$0xff] %v398_v40 }
 0x23c PF: > { %s409_s10 = smul.u32 %s682_s18, %s686_s19  ;;  %s420_s11 = sshll.u32 %s813_s23, 4  ;;  %s835_s11 = int_to_ptr.vmem [resolvable:$true] %s420_s11 }
 0x23d   : > { %s402_s27 = scalar_lea.sflag [#allocation7], %s224_s8  ;;  %s604_s30 = scalar_lea.vmem %s835_s11, 256 }
 0x23e   : > { %s525_s12 = sshll.u32 %s409_s10, 8  ;;  %p605_p7 = scmp.ne.s32.totalorder %s835_s11, %s604_s30 }
 0x23f   : > { %s418_s24 = scalar_lea.hbm %s890_s4, %s525_s12  ;;  %s703_s5 = smov [#allocation6]  }
 0x240   : > { %p606_p9 = pnand %p605_p7, %p782_p6  ;;  %s608_s18 = sshll.u32 %s703_s5, 4  ;;  %s609_s18 = int_to_ptr.vmem [resolvable:$false] %s608_s18 }
 0x241   : > { %s610_s19 = scalar_lea.vmem %s609_s18, 512  ;;  %p611_p11 = scmp.lt.s32.totalorder %s835_s11, %s609_s18 }
 0x242   : > { %p607_p10 = pneg %p606_p9  ;;  %p612_p12 = scmp.lt.s32.totalorder %s610_s19, %s604_s30 }
 0x244   : > { %p613_p13 = por %p612_p12, %p611_p11 }
 0x246   : > { %p614_p0 = pnand %p613_p13, %p607_p10 }
 0x248   : > { %617 = shalt.err (!%p614_p0)
}
 0x249   : > { %s618_s23 = scalar_lea.hbm %s418_s24, 256  ;;  %s622_s9 = scalar_lea.hbm %s890_s4, 512 }
 0x24a   : > { %p619_p1 = scmp.ne.s32.totalorder %s418_s24, %s618_s23  ;;  %p623_p4 = scmp.lt.u32.totalorder %s418_s24, %s890_s4 }
 0x24b   : > { %p624_p5 = scmp.lt.u32.totalorder %s622_s9, %s618_s23  ;;  %p626_p9 = scmp.lt.u32.totalorder %s618_s23, %s418_s24 }
 0x24c   : > { %p620_p2 = pnand %p619_p1, %p782_p6 }
 0x24d   : > { %p625_p7 = por %p624_p5, %p623_p4 }
 0x24e   : > { %p621_p3 = pneg %p620_p2 }
 0x24f   : > { %p627_p11 = por %p626_p9, %p625_p7 }
 0x251   : > { %p628_p10 = pnand %p627_p11, %p621_p3 }
 0x253   : > { %631 = shalt.err (!%p628_p10)
}
 0x254   : > { %526 = dma.vmem_to_hbm [thread:$0]  (%p782_p6), %s835_s11, 256, %s418_s24, %s402_s27  }
 0x255 PF: > { %p532_p12 = scmp.ge.s32.totalorder %s698_s22, 2  ;;  %s432_s13 = sand.u32 1, %s670_s15  }
 0x256   : > { %s433_s14 = scalar_lea.sflag [#allocation7], %s432_s13 }
 0x257   : > { %p529_p13 = pnand %p532_p12, %p789_p8 }
 0x259   : > { %665 = dma.done.wait (!%p529_p13), %s433_s14, 256  }
 0x25a   : > { %667 = vsyncadd (!%p529_p13), %s433_s14, 4294967040  ;;  %s17_s22 = sadd.s32 1, %s698_s22   ;;  %s893_s15 = smov %s674_s16 }
 0x25b   : > { %p14_p0 = scmp.ge.s32.totalorder %s17_s22, 6   ;;  %s894_s16 = smov %s678_s17 }
 0x25c   : > { %s895_s17 = smov %s798_s7  ;;  %s896_s18 = smov %s690_s20 }
 0x25d   : > { %s897_s19 = smov %s694_s21  ;;  %s898_s20 = smov %s901_s25 }
 0x25e   : > { %s899_s21 = smov %s905_s26  ;;  %16 = sbr.rel (!%p14_p0) target bundleno = 5 (0x5), region = 87 }
 0x265   :  { %438 = vsyncpa [#allocation7], 1 }
 0x266   :  { %440 = vsyncpa [#allocation7 + $0x1], 1 }

</bundles_post_ra>
